<compile_context>
chip_gen: v6e
topology: v6e:2x2x1
jax: 0.10.0
libtpu: 0.0.40
codegen_flags: <defaults>
</compile_context>

<pallas_src>
import jax
import jax.numpy as jnp
from jax.experimental import pallas as pl
from jax.experimental.pallas import tpu as pltpu


def _sigmoid_kernel(x_ref, o_ref):
    # Compute in f32 (safe on all generations; v5e has no bf16 VPU/EUP).
    x = x_ref[...].astype(jnp.float32)
    # sigmoid(x) = 1 / (1 + exp(-x)); exp -> EUP, approx reciprocal -> EUP.
    o_ref[...] = pl.reciprocal(1.0 + jnp.exp(-x), approx=True).astype(o_ref.dtype)


_LANE = 128
_TARGET_TM = 2048  # 2048 x 128 f32 = 1 MiB/buffer; 4 MiB total pipelined (in+out, 2 bufs)


def _pick_tile_rows(rows: int) -> int:
    """Pick the row-block height for a (rows, 128) slab."""
    if rows <= 8:
        # Single block covering the whole (tiny) slab; block == full array dims.
        return rows
    # Aim for >= 2 grid steps so the parallel axis can shard across v7x's two
    # TensorCores, while capping per-buffer VMEM at ~1 MiB (safe on every gen).
    tm = min(_TARGET_TM, pl.cdiv(rows, 2))
    # Round up to a multiple of 8 sublanes (Pallas masks any partial last block).
    return ((tm + 7) // 8) * 8


def mynn_forward(x):
    """Reproduce Mynn.forward: reshape to (-1, 1, 2, 2) NCHW, apply sigmoid."""
    x_nchw = jnp.reshape(x, (-1, 1, 2, 2))
    n_elem = x_nchw.size

    # Flatten to a lane-dense 2D slab (rows, 128). Reshape of a contiguous
    # array is free; we only pay a pad copy when numel is not a multiple of 128.
    rows = pl.cdiv(n_elem, _LANE)
    lane_pad = rows * _LANE - n_elem
    flat = jnp.reshape(x_nchw, (-1,))
    if lane_pad:
        # TODO(synk): handle the ragged lane tail with a second tiny call to
        # avoid this HBM copy; never triggered for numel % 128 == 0.
        flat = jnp.pad(flat, (0, lane_pad))
    slab = jnp.reshape(flat, (rows, _LANE))

    tm = _pick_tile_rows(rows)
    grid = (pl.cdiv(rows, tm),)  # partial last block is masked by Pallas

    out_slab = pl.pallas_call(
        _sigmoid_kernel,
        out_shape=jax.ShapeDtypeStruct((rows, _LANE), x_nchw.dtype),
        grid_spec=pltpu.PrefetchScalarGridSpec(
            num_scalar_prefetch=0,
            grid=grid,
            in_specs=[pl.BlockSpec((tm, _LANE), lambda i: (i, 0))],
            out_specs=pl.BlockSpec((tm, _LANE), lambda i: (i, 0)),
        ),
        compiler_params=pltpu.CompilerParams(
            dimension_semantics=("parallel",),  # shards rows across v7x's 2 TCs
        ),
    )(slab)

    out_flat = jnp.reshape(out_slab, (-1,))
    if lane_pad:
        out_flat = out_flat[:n_elem]
    return jnp.reshape(out_flat, x_nchw.shape)


if __name__ == "__main__":
    key = jax.random.PRNGKey(0)
    # Small input consistent with the module: gets reshaped to (-1, 1, 2, 2).
    x = jax.random.normal(key, (2, 4, 16, 16), dtype=jnp.float32)

    fwd = jax.jit(mynn_forward)
    out = jax.block_until_ready(fwd(x))

    # Correctness check against pure-JAX reference (approx reciprocal on the
    # EUP is accurate to well under 1e-3 absolute for sigmoid outputs).
    ref = jax.nn.sigmoid(jnp.reshape(x, (-1, 1, 2, 2)))
    assert out.shape == (512, 1, 2, 2), out.shape
    assert jnp.allclose(out, ref, atol=2e-3, rtol=2e-3), "mismatch vs reference"

    print("KERNEL_OK")
</pallas_src>

<mosaic_0001>
module attributes {stable_mosaic.version = 11 : i64} {
  func.func @_sigmoid_kernel(%arg0: i32, %arg1: memref<8x128xf32, #tpu.memory_space<vmem>>, %arg2: memref<8x128xf32, #tpu.memory_space<vmem>>) attributes {dimension_semantics = [#tpu.dimension_semantics<parallel>], iteration_bounds = array<i64: 2>, scalar_prefetch = 0 : i64, scratch_operands = 0 : i64, tpu.core_type = #tpu.core_type<tc>, window_params = [{transform_indices = @transform_0, window_bounds = array<i64: 8, 128>}, {transform_indices = @transform_1, window_bounds = array<i64: 8, 128>}]} {
    %c0 = arith.constant 0 : index
    %c0_0 = arith.constant 0 : index
    %0 = vector.load %arg1[%c0, %c0_0] : memref<8x128xf32, #tpu.memory_space<vmem>>, vector<8x128xf32>
    %cst = arith.constant 0.000000e+00 : f32
    %1 = vector.broadcast %cst : f32 to vector<8x128xf32>
    %2 = arith.subf %1, %0 : vector<8x128xf32>
    %3 = math.exp %2 : vector<8x128xf32>
    %cst_1 = arith.constant 1.000000e+00 : f32
    %4 = vector.broadcast %cst_1 : f32 to vector<8x128xf32>
    %5 = arith.addf %4, %3 : vector<8x128xf32>
    %6 = tpu.reciprocal %5 {approx = true} : vector<8x128xf32> -> vector<8x128xf32>
    %c0_2 = arith.constant 0 : index
    %c0_3 = arith.constant 0 : index
    %7 = vector.load %arg2[%c0_2, %c0_3] : memref<8x128xf32, #tpu.memory_space<vmem>>, vector<8x128xf32>
    tpu.vector_store %arg2[%c0_2, %c0_3], %6 {strides = array<i32>} : memref<8x128xf32, #tpu.memory_space<vmem>>, vector<8x128xf32>,
    return
  }
  func.func @transform_0(%arg0: i32) -> (i32, i32) {
    %c0_i32 = arith.constant 0 : i32
    %c0_i32_0 = arith.constant 0 : i32
    return %arg0, %c0_i32 : i32, i32
  }
  func.func @transform_1(%arg0: i32) -> (i32, i32) {
    %c0_i32 = arith.constant 0 : i32
    %c0_i32_0 = arith.constant 0 : i32
    return %arg0, %c0_i32 : i32, i32
  }
}

</mosaic_0001>

<bundles_post_ra>
// kernel: mynn_forward.1
= control target key start
LH: loop header
LB: loop body
LE: loop exit
PB: predicated region body
PF: predicated region fallthrough
CT: control target
= control target key end

     0   :  { %s197_s6 = smov 0   ;;  %s217_s0 = inlined_call_operand.vmem [shape: f32[16,128], index: 0, kind: input, shape index: {}]   ;;  %s218_s1 = inlined_call_operand.vmem [shape: f32[16,128], index: 1, kind: output, shape index: {}]  }
   0x1 LB: > { %s172_s7 = sadd.s32 4294967295, %s199_s6   ;;  %p176_p0 = scmp.ge.s32.totalorder %s199_s6, 1  ;;  %s199_s6 = sphi %s197_s6, %s11_s6  }
   0x2   : > { %p86_p1 = scmp.lt.s32.totalorder %s199_s6, 3 }
   0x4   : > { %p87_p2 = pnand %p176_p0, %p86_p1 }
   0x5   : > { %p104_p3 = scmp.lt.s32.totalorder (!%p87_p2), %s172_s7, 1 }
   0x6   : > { %90 = sbr.rel (%p87_p2) target bundleno = 50 (0x32), region = 24 }
   0xb   : > { %s220_s7 = smov (!%p104_p3, %s172_s7), 1 }
   0xc   : > { %s177_s8 = sshll.u32 %s220_s7, 3 }
   0xd   : > { %s107_s11 = scalar_lea.vmem %s217_s0, %s177_s8  ;;  %s111_s14 = scalar_lea.vmem %s218_s1, %s177_s8 }
   0xe   : > { %v112_v0 = vld [vmem:[%s107_s11] sm:$0xff] }
   0xf   : > { %v113_v1 = vsub.f32 0.0, %v112_v0 }
  0x11   : > { %v114_v2 = vmul.f32 1.442695, %v113_v1 }
  0x13   : > { %189 = vpow2.f32 %v114_v2 }
  0x20   : > { %v190_v3 = vpop.eup %189 }
  0x21   : > { %v116_v4 = vadd.f32 1.0, %v190_v3 }
  0x23   : > { %191 = vrcp.f32 %v116_v4 }
  0x30   : > { %v192_v5 = vpop.eup %191 }
  0x31   : > { %118 = vst [vmem:[%s111_s14] sm:$0xff] %v192_v5 }
  0x32 PF: > { %s11_s6 = sadd.s32 1, %s199_s6  }
  0x33   : > { %p8_p4 = scmp.ge.s32.totalorder %s11_s6, 4  }
  0x35   :  { %10 = sbr.rel (!%p8_p4) target bundleno = 1 (0x1), region = 54 }

</bundles_post_ra>
